<compile_context>
chip_gen: v5e
topology: v5e:2x2
jax: 0.10.0
libtpu: 0.0.40
codegen_flags: <defaults>
</compile_context>

<pallas_src>
import functools

import jax
import jax.numpy as jnp
from jax.experimental import pallas as pl
from jax.experimental.pallas import tpu as pltpu

_LANE = 128      # vreg lane width
_SUBLANE = 8     # vreg sublane count (f32)


def _round_up(x, m):
    return ((x + m - 1) // m) * m


def _mlp_fused_kernel(*refs, num_layers):
    """Fused MLP: refs = (x, w0, b0, w1, b1, ..., w_{L-1}, b_{L-1}, out)."""
    x_ref = refs[0]
    o_ref = refs[-1]

    h = x_ref[...].astype(jnp.float32)
    for i in range(num_layers):
        w = refs[1 + 2 * i][...]
        b = refs[2 + 2 * i][...]
        # MXU matmul with f32 accumulation; bias broadcast along batch.
        h = jnp.dot(h, w, preferred_element_type=jnp.float32) + b
        if i < num_layers - 1:
            # SiLU(x) = x * sigmoid(x); f32 on VPU, sigmoid on EUP (free slot).
            h = h * jax.nn.sigmoid(h)
    o_ref[...] = h.astype(o_ref.dtype)


def mlp_forward(params, x, *, block_m=256):
    """Fused MLP forward pass as a single Pallas call.

    params: list of (w [Din, Dout], b [Dout]) per layer (last layer has no SiLU).
    x:      [B, input_dim]
    """
    B, in_dim = x.shape
    out_dim = params[-1][0].shape[1]
    num_layers = len(params)

    # --- pad batch (sublane) and choose the batch tile -----------------------
    Bp = _round_up(B, _SUBLANE)
    tm = min(block_m, Bp)
    Bp = _round_up(Bp, tm)

    # --- pad feature dims to lane width (lane-dense, unmasked stores) --------
    in_p = _round_up(in_dim, _LANE)
    x_p = jnp.zeros((Bp, in_p), x.dtype).at[:B, :in_dim].set(x)

    padded_params = []
    d_prev = in_p
    for w, b in params:
        din, dout = w.shape
        dout_p = _round_up(dout, _LANE)
        w_p = jnp.zeros((d_prev, dout_p), w.dtype).at[:din, :dout].set(w)
        b_p = jnp.zeros((1, dout_p), b.dtype).at[0, :dout].set(b)
        padded_params.append((w_p, b_p))
        d_prev = dout_p
    out_p = d_prev

    # --- specs: tile over batch; weights/bias are whole-array resident blocks
    # TODO(synk): for layers too large to keep all weights resident in VMEM,
    # fall back to a per-layer (M, N, K) tiled matmul with an f32 accumulator.
    in_specs = [pl.BlockSpec((tm, in_p), lambda i: (i, 0))]
    flat_inputs = [x_p]
    for w_p, b_p in padded_params:
        in_specs.append(pl.BlockSpec(w_p.shape, lambda i: (0, 0)))
        in_specs.append(pl.BlockSpec(b_p.shape, lambda i: (0, 0)))
        flat_inputs.append(w_p)
        flat_inputs.append(b_p)

    kernel = functools.partial(_mlp_fused_kernel, num_layers=num_layers)
    out_padded = pl.pallas_call(
        kernel,
        out_shape=jax.ShapeDtypeStruct((Bp, out_p), x.dtype),
        grid=(Bp // tm,),
        in_specs=in_specs,
        out_specs=pl.BlockSpec((tm, out_p), lambda i: (i, 0)),
        compiler_params=pltpu.CompilerParams(
            dimension_semantics=("parallel",),
        ),
    )(*flat_inputs)

    return out_padded[:B, :out_dim]


def init_mlp_params(key, input_dim, hidden_cells, output_dim):
    """Deterministic init mirroring nn.Linear's U(-1/sqrt(fan_in), 1/sqrt(fan_in))."""
    dims = [input_dim] + list(hidden_cells) + [output_dim]
    params = []
    for din, dout in zip(dims[:-1], dims[1:]):
        key, kw, kb = jax.random.split(key, 3)
        bound = 1.0 / (din ** 0.5)
        w = jax.random.uniform(kw, (din, dout), jnp.float32, -bound, bound)
        b = jax.random.uniform(kb, (dout,), jnp.float32, -bound, bound)
        params.append((w, b))
    return params


if __name__ == "__main__":
    # Small shapes consistent with the module's forward.
    batch = 8
    input_dim = 32
    hidden_cells = [64, 64]
    output_dim = 16

    key = jax.random.PRNGKey(0)
    key, kx = jax.random.split(key)
    x = jax.random.normal(kx, (batch, input_dim), jnp.float32)

    params = init_mlp_params(key, input_dim, hidden_cells, output_dim)

    out = mlp_forward(params, x)
    out = jax.block_until_ready(out)

    # Pure-JAX reference (highest precision matmuls).
    hp = jax.lax.Precision.HIGHEST
    ref = x
    for w, b in params[:-1]:
        ref = jax.nn.silu(jnp.dot(ref, w, precision=hp) + b)
    w, b = params[-1]
    ref = jnp.dot(ref, w, precision=hp) + b

    assert out.shape == (batch, output_dim)
    assert jnp.allclose(out, ref, atol=1e-4, rtol=1e-4), (
        float(jnp.max(jnp.abs(out - ref))))

    print("KERNEL_OK")
</pallas_src>

<mosaic_0001>
module attributes {stable_mosaic.version = 11 : i64} {
  func.func @_mlp_fused_kernel(%arg0: i32, %arg1: memref<8x128xf32, #tpu.memory_space<vmem>>, %arg2: memref<128x128xf32, #tpu.memory_space<vmem>>, %arg3: memref<1x128xf32, #tpu.memory_space<vmem>>, %arg4: memref<128x128xf32, #tpu.memory_space<vmem>>, %arg5: memref<1x128xf32, #tpu.memory_space<vmem>>, %arg6: memref<128x128xf32, #tpu.memory_space<vmem>>, %arg7: memref<1x128xf32, #tpu.memory_space<vmem>>, %arg8: memref<8x128xf32, #tpu.memory_space<vmem>>) attributes {dimension_semantics = [#tpu.dimension_semantics<parallel>], iteration_bounds = array<i64: 1>, scalar_prefetch = 0 : i64, scratch_operands = 0 : i64, tpu.core_type = #tpu.core_type<tc>, window_params = [{transform_indices = @transform_0, window_bounds = array<i64: 8, 128>}, {pipeline_mode = #tpu.pipeline_mode<synchronous>, transform_indices = @transform_1, window_bounds = array<i64: 128, 128>}, {pipeline_mode = #tpu.pipeline_mode<synchronous>, transform_indices = @transform_2, window_bounds = array<i64: 1, 128>}, {pipeline_mode = #tpu.pipeline_mode<synchronous>, transform_indices = @transform_3, window_bounds = array<i64: 128, 128>}, {pipeline_mode = #tpu.pipeline_mode<synchronous>, transform_indices = @transform_4, window_bounds = array<i64: 1, 128>}, {pipeline_mode = #tpu.pipeline_mode<synchronous>, transform_indices = @transform_5, window_bounds = array<i64: 128, 128>}, {pipeline_mode = #tpu.pipeline_mode<synchronous>, transform_indices = @transform_6, window_bounds = array<i64: 1, 128>}, {transform_indices = @transform_7, window_bounds = array<i64: 8, 128>}]} {
    %c0 = arith.constant 0 : index
    %c0_0 = arith.constant 0 : index
    %0 = vector.load %arg1[%c0, %c0_0] : memref<8x128xf32, #tpu.memory_space<vmem>>, vector<8x128xf32>
    %c0_1 = arith.constant 0 : index
    %c0_2 = arith.constant 0 : index
    %1 = vector.load %arg2[%c0_1, %c0_2] : memref<128x128xf32, #tpu.memory_space<vmem>>, vector<128x128xf32>
    %c0_3 = arith.constant 0 : index
    %c0_4 = arith.constant 0 : index
    %2 = vector.load %arg3[%c0_3, %c0_4] : memref<1x128xf32, #tpu.memory_space<vmem>>, vector<1x128xf32>
    %cst = arith.constant dense<0.000000e+00> : vector<8x128xf32>
    %3 = tpu.matmul %0, %1, %cst {dimension_numbers = #tpu.dot_dimension_numbers<[1], [0], [0], [1], [0, 0, 1, 1], [], []>} : vector<8x128xf32>, vector<128x128xf32>, vector<8x128xf32> -> vector<8x128xf32>
    %4 = vector.broadcast %2 : vector<1x128xf32> to vector<8x128xf32>
    %5 = arith.addf %3, %4 : vector<8x128xf32>
    %6 = arith.negf %5 : vector<8x128xf32>
    %7 = math.exp %6 : vector<8x128xf32>
    %cst_5 = arith.constant 1.000000e+00 : f32
    %8 = vector.broadcast %cst_5 : f32 to vector<8x128xf32>
    %9 = arith.addf %8, %7 : vector<8x128xf32>
    %10 = arith.divf %8, %9 : vector<8x128xf32>
    %11 = arith.mulf %5, %10 : vector<8x128xf32>
    %c0_6 = arith.constant 0 : index
    %c0_7 = arith.constant 0 : index
    %12 = vector.load %arg4[%c0_6, %c0_7] : memref<128x128xf32, #tpu.memory_space<vmem>>, vector<128x128xf32>
    %c0_8 = arith.constant 0 : index
    %c0_9 = arith.constant 0 : index
    %13 = vector.load %arg5[%c0_8, %c0_9] : memref<1x128xf32, #tpu.memory_space<vmem>>, vector<1x128xf32>
    %cst_10 = arith.constant dense<0.000000e+00> : vector<8x128xf32>
    %14 = tpu.matmul %11, %12, %cst_10 {dimension_numbers = #tpu.dot_dimension_numbers<[1], [0], [0], [1], [0, 0, 1, 1], [], []>} : vector<8x128xf32>, vector<128x128xf32>, vector<8x128xf32> -> vector<8x128xf32>
    %15 = vector.broadcast %13 : vector<1x128xf32> to vector<8x128xf32>
    %16 = arith.addf %14, %15 : vector<8x128xf32>
    %17 = arith.negf %16 : vector<8x128xf32>
    %18 = math.exp %17 : vector<8x128xf32>
    %cst_11 = arith.constant 1.000000e+00 : f32
    %19 = vector.broadcast %cst_11 : f32 to vector<8x128xf32>
    %20 = arith.addf %19, %18 : vector<8x128xf32>
    %21 = arith.divf %19, %20 : vector<8x128xf32>
    %22 = arith.mulf %16, %21 : vector<8x128xf32>
    %c0_12 = arith.constant 0 : index
    %c0_13 = arith.constant 0 : index
    %23 = vector.load %arg6[%c0_12, %c0_13] : memref<128x128xf32, #tpu.memory_space<vmem>>, vector<128x128xf32>
    %c0_14 = arith.constant 0 : index
    %c0_15 = arith.constant 0 : index
    %24 = vector.load %arg7[%c0_14, %c0_15] : memref<1x128xf32, #tpu.memory_space<vmem>>, vector<1x128xf32>
    %cst_16 = arith.constant dense<0.000000e+00> : vector<8x128xf32>
    %25 = tpu.matmul %22, %23, %cst_16 {dimension_numbers = #tpu.dot_dimension_numbers<[1], [0], [0], [1], [0, 0, 1, 1], [], []>} : vector<8x128xf32>, vector<128x128xf32>, vector<8x128xf32> -> vector<8x128xf32>
    %26 = vector.broadcast %24 : vector<1x128xf32> to vector<8x128xf32>
    %27 = arith.addf %25, %26 : vector<8x128xf32>
    %c0_17 = arith.constant 0 : index
    %c0_18 = arith.constant 0 : index
    %28 = vector.load %arg8[%c0_17, %c0_18] : memref<8x128xf32, #tpu.memory_space<vmem>>, vector<8x128xf32>
    tpu.vector_store %arg8[%c0_17, %c0_18], %27 {strides = array<i32>} : memref<8x128xf32, #tpu.memory_space<vmem>>, vector<8x128xf32>,
    return
  }
  func.func @transform_0(%arg0: i32) -> (i32, i32) {
    %c0_i32 = arith.constant 0 : i32
    %c0_i32_0 = arith.constant 0 : i32
    return %arg0, %c0_i32 : i32, i32
  }
  func.func @transform_1(%arg0: i32) -> (i32, i32) {
    %c0_i32 = arith.constant 0 : i32
    %c0_i32_0 = arith.constant 0 : i32
    %c0_i32_1 = arith.constant 0 : i32
    return %c0_i32, %c0_i32_0 : i32, i32
  }
  func.func @transform_2(%arg0: i32) -> (i32, i32) {
    %c0_i32 = arith.constant 0 : i32
    %c0_i32_0 = arith.constant 0 : i32
    %c0_i32_1 = arith.constant 0 : i32
    return %c0_i32, %c0_i32_0 : i32, i32
  }
  func.func @transform_3(%arg0: i32) -> (i32, i32) {
    %c0_i32 = arith.constant 0 : i32
    %c0_i32_0 = arith.constant 0 : i32
    %c0_i32_1 = arith.constant 0 : i32
    return %c0_i32, %c0_i32_0 : i32, i32
  }
  func.func @transform_4(%arg0: i32) -> (i32, i32) {
    %c0_i32 = arith.constant 0 : i32
    %c0_i32_0 = arith.constant 0 : i32
    %c0_i32_1 = arith.constant 0 : i32
    return %c0_i32, %c0_i32_0 : i32, i32
  }
  func.func @transform_5(%arg0: i32) -> (i32, i32) {
    %c0_i32 = arith.constant 0 : i32
    %c0_i32_0 = arith.constant 0 : i32
    %c0_i32_1 = arith.constant 0 : i32
    return %c0_i32, %c0_i32_0 : i32, i32
  }
  func.func @transform_6(%arg0: i32) -> (i32, i32) {
    %c0_i32 = arith.constant 0 : i32
    %c0_i32_0 = arith.constant 0 : i32
    %c0_i32_1 = arith.constant 0 : i32
    return %c0_i32, %c0_i32_0 : i32, i32
  }
  func.func @transform_7(%arg0: i32) -> (i32, i32) {
    %c0_i32 = arith.constant 0 : i32
    %c0_i32_0 = arith.constant 0 : i32
    return %arg0, %c0_i32 : i32, i32
  }
}

</mosaic_0001>

<bundles_post_ra>
// kernel: tpu_custom_call.1
= control target key start
LH: loop header
LB: loop body
LE: loop exit
PB: predicated region body
PF: predicated region fallthrough
CT: control target
= control target key end

     0   :  { %12 = vsyncpa [#allocation3], 0  ;;  %s488_s0 = inlined_call_operand.hbm [shape: f32[8,128], index: 0, kind: input, shape index: {}]   ;;  %s489_s1 = inlined_call_operand.hbm [shape: f32[128,128], index: 1, kind: input, shape index: {}]   ;;  %s490_s2 = inlined_call_operand.vmem [shape: f32[1,128], index: 2, kind: input, shape index: {}]   ;;  %s491_s3 = inlined_call_operand.hbm [shape: f32[128,128], index: 3, kind: input, shape index: {}]   ;;  %s492_s4 = inlined_call_operand.vmem [shape: f32[1,128], index: 4, kind: input, shape index: {}]   ;;  %s493_s5 = inlined_call_operand.hbm [shape: f32[128,128], index: 5, kind: input, shape index: {}]   ;;  %s494_s6 = inlined_call_operand.vmem [shape: f32[1,128], index: 6, kind: input, shape index: {}]   ;;  %s495_s7 = inlined_call_operand.hbm [shape: f32[8,128], index: 7, kind: output, shape index: {}]  }
   0x1   :  { %13 = vsyncpa [#allocation6], 0 }
   0x2   :  { %14 = vsyncpa [#allocation9], 0  ;;  %s31_s26 = sshll.u32 %s489_s1, 4  ;;  %s32_s26 = int_to_ptr.hbm [resolvable:$true] %s31_s26 }
   0x3   :  { %15 = vsyncpa [#allocation4], 0  ;;  %s417_s27 = smov [#allocation5]   ;;  %s21_s8 = sshll.u32 %s488_s0, 4  ;;  %s22_s8 = int_to_ptr.hbm [resolvable:$true] %s21_s8 }
   0x4   :  { %s33_s28 = sshll.u32 %s417_s27, 4  ;;  %s418_s9 = smov 128   ;;  %s34_s28 = int_to_ptr.vmem [resolvable:$true] %s33_s28 }
   0x5   :  { %s419_s10 = smov 8   ;;  %s420_s11 = smov [#allocation2]  }
   0x6   :  { %39 = dma.hbm_to_vmem [thread:$0]  %s32_s26, 2048, %s34_s28, [#allocation6], %s418_s9, %s418_s9, %s419_s10  }
   0x7   :  { %s23_s12 = sshll.u32 %s420_s11, 4  ;;  %s46_s15 = sshll.u32 %s491_s3, 4  ;;  %s24_s12 = int_to_ptr.vmem [resolvable:$true] %s23_s12  ;;  %s47_s15 = int_to_ptr.hbm [resolvable:$true] %s46_s15 }
   0x8   :  { %26 = dma.hbm_to_vmem [thread:$0]  %s22_s8, 128, %s24_s12, [#allocation3]  }
   0x9   :  { %s61_s17 = sshll.u32 %s493_s5, 4  ;;  %s421_s18 = smov [#allocation7]   ;;  %s62_s17 = int_to_ptr.hbm [resolvable:$true] %s61_s17 }
   0xa   :  { %s48_s19 = sshll.u32 %s421_s18, 4  ;;  %s422_s0 = smov [#allocation8]   ;;  %s49_s19 = int_to_ptr.vmem [resolvable:$true] %s48_s19 }
   0xb   :  { %54 = dma.hbm_to_vmem [thread:$0]  %s47_s15, 2048, %s49_s19, [#allocation6], %s418_s9, %s418_s9, %s419_s10  }
   0xc   :  { %s63_s20 = sshll.u32 %s422_s0, 4  ;;  %s64_s20 = int_to_ptr.vmem [resolvable:$true] %s63_s20 }
   0xd   :  { %69 = dma.hbm_to_vmem [thread:$0]  %s62_s17, 2048, %s64_s20, [#allocation9], %s418_s9, %s418_s9, %s419_s10  }
   0xe   :  { %409 = dma.done.wait [#allocation3], 128  }
   0xf   :  { %410 = vsyncadd [#allocation3], 4294967168 }
  0x10   :  { %411 = dma.done.wait [#allocation6], 4096  }
  0x11   :  { %412 = vsyncadd [#allocation6], 4294963200 }
  0x12   :  { %413 = dma.done.wait [#allocation9], 2048  }
  0x13   :  { %414 = vsyncadd [#allocation9], 4294965248  ;;  %v104_v0 = vld [vmem:[#allocation5 + $0x78] sm:$0xff]  ;;  %v103_v1 = vld [vmem:[#allocation5 + $0x70] sm:$0xff]  ;;  %s423_s23 = smov [#allocation10]   ;;  %s257_s27 = sshll.u32 %s495_s7, 4  ;;  %s258_s27 = int_to_ptr.hbm [resolvable:$true] %s257_s27 }
  0x14   :  { %109 = vmatpush.msra.mxu0 %v104_v0  ;;  %v102_v2 = vld [vmem:[#allocation5 + $0x68] sm:$0xff]  ;;  %v101_v3 = vld [vmem:[#allocation5 + $0x60] sm:$0xff]  ;;  %v100_v4 = vld [vmem:[#allocation5 + $0x58] sm:$0xff]  ;;  %s255_s24 = sshll.u32 %s423_s23, 4  ;;  %s256_s24 = int_to_ptr.vmem [resolvable:$true] %s255_s24 }
  0x15   :  { %v99_v5 = vld [vmem:[#allocation5 + $0x50] sm:$0xff]  ;;  %v98_v6 = vld [vmem:[#allocation5 + $0x48] sm:$0xff]  ;;  %v97_v7 = vld [vmem:[#allocation5 + $0x40] sm:$0xff] }
  0x16   :  { %110 = vmatpush.msra.mxu0 %v103_v1  ;;  %v96_v8 = vld [vmem:[#allocation5 + $0x38] sm:$0xff]  ;;  %v95_v9 = vld [vmem:[#allocation5 + $0x30] sm:$0xff]  ;;  %v94_v10 = vld [vmem:[#allocation5 + $0x28] sm:$0xff] }
  0x17   :  { %v93_v11 = vld [vmem:[#allocation5 + $0x20] sm:$0xff]  ;;  %v92_v12 = vld [vmem:[#allocation5 + $0x18] sm:$0xff]  ;;  %v91_v13 = vld [vmem:[#allocation5 + $0x10] sm:$0xff] }
  0x18   :  { %111 = vmatpush.msra.mxu0 %v102_v2  ;;  %v90_v14 = vld [vmem:[#allocation5 + $0x8] sm:$0xff]  ;;  %v89_v15 = vld [vmem:[#allocation5] sm:$0xff]  ;;  %v88_v16 = vld [vmem:[#allocation2] sm:$0xff] }
  0x19   :  { %v164_v17 = vld [vmem:[#allocation7 + $0x78] sm:$0xff]  ;;  %v163_v18 = vld [vmem:[#allocation7 + $0x70] sm:$0xff]  ;;  %v162_v19 = vld [vmem:[#allocation7 + $0x68] sm:$0xff] }
  0x1a   :  { %112 = vmatpush.msra.mxu0 %v101_v3  ;;  %169 = vmatpush.msra.mxu1 %v164_v17  ;;  %v161_v20 = vld [vmem:[#allocation7 + $0x60] sm:$0xff]  ;;  %v160_v21 = vld [vmem:[#allocation7 + $0x58] sm:$0xff]  ;;  %v159_v22 = vld [vmem:[#allocation7 + $0x50] sm:$0xff] }
  0x1b   :  { %v158_v23 = vld [vmem:[#allocation7 + $0x48] sm:$0xff]  ;;  %v157_v24 = vld [vmem:[#allocation7 + $0x40] sm:$0xff]  ;;  %v156_v25 = vld [vmem:[#allocation7 + $0x38] sm:$0xff] }
  0x1c   :  { %113 = vmatpush.msra.mxu0 %v100_v4  ;;  %170 = vmatpush.msra.mxu1 %v163_v18  ;;  %v155_v26 = vld [vmem:[#allocation7 + $0x30] sm:$0xff]  ;;  %v154_v27 = vld [vmem:[#allocation7 + $0x28] sm:$0xff]  ;;  %v153_v28 = vld [vmem:[#allocation7 + $0x20] sm:$0xff] }
  0x1d   :  { %v152_v29 = vld [vmem:[#allocation7 + $0x18] sm:$0xff]  ;;  %v151_v30 = vld [vmem:[#allocation7 + $0x10] sm:$0xff]  ;;  %v150_v31 = vld [vmem:[#allocation7 + $0x8] sm:$0xff] }
  0x1e   :  { %114 = vmatpush.msra.mxu0 %v99_v5  ;;  %171 = vmatpush.msra.mxu1 %v162_v19  ;;  %v278_v32 = vld [vmem:[%s490_s2] ss:$0 sm:$0xff]  ;;  %v149_v33 = vld [vmem:[#allocation7] sm:$0xff]  ;;  %v223_v51 = vld [vmem:[#allocation8 + $0x70] sm:$0xff] }
  0x1f   :  { %v224_v50 = vld [vmem:[#allocation8 + $0x78] sm:$0xff]  ;;  %v222_v52 = vld [vmem:[#allocation8 + $0x68] sm:$0xff]  ;;  %v221_v53 = vld [vmem:[#allocation8 + $0x60] sm:$0xff] }
  0x20   :  { %115 = vmatpush.msra.mxu0 %v98_v6  ;;  %172 = vmatpush.msra.mxu1 %v161_v20  ;;  %v220_v54 = vld [vmem:[#allocation8 + $0x58] sm:$0xff]  ;;  %v219_v55 = vld [vmem:[#allocation8 + $0x50] sm:$0xff]  ;;  %v218_v56 = vld [vmem:[#allocation8 + $0x48] sm:$0xff] }
  0x21   :  { %229 = vmatpush.msra.mxu2 %v224_v50  ;;  %v217_v57 = vld [vmem:[#allocation8 + $0x40] sm:$0xff]  ;;  %v216_v58 = vld [vmem:[#allocation8 + $0x38] sm:$0xff]  ;;  %v215_v59 = vld [vmem:[#allocation8 + $0x30] sm:$0xff] }
  0x22   :  { %116 = vmatpush.msra.mxu0 %v97_v7  ;;  %173 = vmatpush.msra.mxu1 %v160_v21  ;;  %v214_v60 = vld [vmem:[#allocation8 + $0x28] sm:$0xff]  ;;  %v213_v61 = vld [vmem:[#allocation8 + $0x20] sm:$0xff]  ;;  %v212_v62 = vld [vmem:[#allocation8 + $0x18] sm:$0xff] }
  0x23   :  { %230 = vmatpush.msra.mxu2 %v223_v51  ;;  %v211_v63 = vld [vmem:[#allocation8 + $0x10] sm:$0xff]  ;;  %v210_v0 = vld [vmem:[#allocation8 + $0x8] sm:$0xff]  ;;  %v279_v1 = vld [vmem:[%s492_s4] ss:$0 sm:$0xff] }
  0x24   :  { %117 = vmatpush.msra.mxu0 %v96_v8  ;;  %174 = vmatpush.msra.mxu1 %v159_v22  ;;  %v209_v2 = vld [vmem:[#allocation8] sm:$0xff]  ;;  %v280_v19 = vld [vmem:[%s494_s6] ss:$0 sm:$0xff] }
  0x25   :  { %231 = vmatpush.msra.mxu2 %v222_v52 }
  0x26   :  { %118 = vmatpush.msra.mxu0 %v95_v9  ;;  %175 = vmatpush.msra.mxu1 %v158_v23 }
  0x27   :  { %232 = vmatpush.msra.mxu2 %v221_v53 }
  0x28   :  { %119 = vmatpush.msra.mxu0 %v94_v10  ;;  %176 = vmatpush.msra.mxu1 %v157_v24 }
  0x29   :  { %233 = vmatpush.msra.mxu2 %v220_v54 }
  0x2a   :  { %120 = vmatpush.msra.mxu0 %v93_v11  ;;  %177 = vmatpush.msra.mxu1 %v156_v25 }
  0x2b   :  { %234 = vmatpush.msra.mxu2 %v219_v55 }
  0x2c   :  { %121 = vmatpush.msra.mxu0 %v92_v12  ;;  %178 = vmatpush.msra.mxu1 %v155_v26 }
  0x2d   :  { %235 = vmatpush.msra.mxu2 %v218_v56 }
  0x2e   :  { %122 = vmatpush.msra.mxu0 %v91_v13  ;;  %179 = vmatpush.msra.mxu1 %v154_v27 }
  0x2f   :  { %236 = vmatpush.msra.mxu2 %v217_v57 }
  0x30   :  { %123 = vmatpush.msra.mxu0 %v90_v14  ;;  %180 = vmatpush.msra.mxu1 %v153_v28 }
  0x31   :  { %237 = vmatpush.msra.mxu2 %v216_v58 }
  0x32   :  { %124 = vmatpush.msra.mxu0 %v89_v15  ;;  %181 = vmatpush.msra.mxu1 %v152_v29 }
  0x33   :  { %125 = vmatmul.f32.vlgmr.msra.gmra.mxu0 %v88_v16  ;;  %238 = vmatpush.msra.mxu2 %v215_v59 }
  0x34   :  { %182 = vmatpush.msra.mxu1 %v151_v30 }
  0x35   :  { %239 = vmatpush.msra.mxu2 %v214_v60 }
  0x36   :  { %183 = vmatpush.msra.mxu1 %v150_v31 }
  0x37   :  { %240 = vmatpush.msra.mxu2 %v213_v61 }
  0x38   :  { %184 = vmatpush.msra.mxu1 %v149_v33 }
  0x39   :  { %241 = vmatpush.msra.mxu2 %v212_v62 }
  0x3b   :  { %242 = vmatpush.msra.mxu2 %v211_v63 }
  0x3d   :  { %243 = vmatpush.msra.mxu2 %v210_v0 }
  0x3f   :  { %244 = vmatpush.msra.mxu2 %v209_v2 }
  0xb0   :  { %v126_v34 = vpop.f32.mrf.mxu0 }
  0xb1   :  { %v127_v35 = vadd.f32 %v278_v32, %v126_v34 }
  0xb3   :  { %v269_v36 = vmul.f32 -1.442695, %v127_v35 }
  0xb5   :  { %281 = vpow2.f32 %v269_v36 }
  0xbb   :  { %v282_v37 = vpop.eup %281 }
  0xbc   :  { %v132_v38 = vadd.f32 1.0, %v282_v37 }
  0xbe   :  { %283 = vrcp.f32 %v132_v38  ;;  %v144_v42 = vand.u32 2147483648, %v132_v38  ;;  %v142_v44 = vand.u32 2147483647, %v132_v38  ;;  %vm138_vm1 = vweird.f32 %v132_v38 }
  0xc0   :  { %v145_v46 = vor.u32 1.1754944e-38, %v144_v42  ;;  %vm143_vm3 = vcmp.eq.f32.partialorder %v142_v44, 8.507059e+37 }
  0xc4   :  { %v284_v39 = vpop.eup %283 }
  0xc5   :  { %v134_v40 = vmul.f32 %v284_v39, %v132_v38  ;;  %vm139_vm0 = vweird.f32 %v284_v39 }
  0xc6   :  { %vm140_vm2 = vmor %vm138_vm1, %vm139_vm0 }
  0xc7   :  { %v135_v41 = vsub.f32 1.0, %v134_v40 }
  0xc9   :  { %v136_v43 = vmul.f32 %v284_v39, %v135_v41 }
  0xcb   :  { %v137_v45 = vadd.f32 %v284_v39, %v136_v43 }
  0xcd   :  { %v141_v47 = vsel %vm140_vm2, %v284_v39, %v137_v45 }
  0xce   :  { %v146_v48 = vsel %vm143_vm3, %v145_v46, %v141_v47 }
  0xcf   :  { %v148_v49 = vmul.f32 %v146_v48, %v127_v35 }
  0xd1   :  { %185 = vmatmul.f32.vlgmr.msra.gmra.mxu1 %v148_v49 }
 0x14e   :  { %v186_v3 = vpop.f32.mrf.mxu1 }
 0x14f   :  { %v187_v4 = vadd.f32 %v279_v1, %v186_v3 }
 0x151   :  { %v270_v5 = vmul.f32 -1.442695, %v187_v4 }
 0x153   :  { %285 = vpow2.f32 %v270_v5 }
 0x159   :  { %v286_v6 = vpop.eup %285 }
 0x15a   :  { %v192_v7 = vadd.f32 1.0, %v286_v6 }
 0x15c   :  { %287 = vrcp.f32 %v192_v7  ;;  %v204_v11 = vand.u32 2147483648, %v192_v7  ;;  %v202_v13 = vand.u32 2147483647, %v192_v7  ;;  %vm198_vm5 = vweird.f32 %v192_v7 }
 0x15e   :  { %v205_v15 = vor.u32 1.1754944e-38, %v204_v11  ;;  %vm203_vm7 = vcmp.eq.f32.partialorder %v202_v13, 8.507059e+37 }
 0x162   :  { %v288_v8 = vpop.eup %287 }
 0x163   :  { %v194_v9 = vmul.f32 %v288_v8, %v192_v7  ;;  %vm199_vm4 = vweird.f32 %v288_v8 }
 0x164   :  { %vm200_vm6 = vmor %vm198_vm5, %vm199_vm4 }
 0x165   :  { %v195_v10 = vsub.f32 1.0, %v194_v9 }
 0x167   :  { %v196_v12 = vmul.f32 %v288_v8, %v195_v10 }
 0x169   :  { %v197_v14 = vadd.f32 %v288_v8, %v196_v12 }
 0x16b   :  { %v201_v16 = vsel %vm200_vm6, %v288_v8, %v197_v14 }
 0x16c   :  { %v206_v17 = vsel %vm203_vm7, %v205_v15, %v201_v16 }
 0x16d   :  { %v208_v18 = vmul.f32 %v206_v17, %v187_v4 }
 0x16f   :  { %245 = vmatmul.f32.vlgmr.msra.gmra.mxu2 %v208_v18 }
 0x1f2   :  { %v246_v20 = vpop.f32.mrf.mxu2 }
 0x1f3   :  { %v247_v21 = vadd.f32 %v280_v19, %v246_v20 }
 0x1f5   :  { %249 = vst [vmem:[#allocation10] sm:$0xff] %v247_v21 }
 0x1f6   :  { %260 = dma.vmem_to_hbm [thread:$0]  %s256_s24, 128, %s258_s27, [#allocation4]  }
 0x1f7   :  { %415 = dma.done.wait [#allocation4], 128  }
 0x1f8   :  { %416 = vsyncadd [#allocation4], 4294967168 }
 0x1f9   :  { %265 = vsyncpa [#allocation3], 1 }
 0x1fa   :  { %266 = vsyncpa [#allocation6], 1 }
 0x1fb   :  { %267 = vsyncpa [#allocation9], 1 }
 0x1fc   :  { %268 = vsyncpa [#allocation4], 1 }

</bundles_post_ra>
